<compile_context>
chip_gen: v5e
topology: v5e:2x2
jax: 0.10.0
libtpu: 0.0.40
codegen_flags: <defaults>
</compile_context>

<pallas_src>
import functools

import jax
import jax.numpy as jnp
from jax.experimental import pallas as pl
from jax.experimental.pallas import tpu as pltpu

LANES = 128                  # lane (minor) axis of every block
MAX_ROWS = 4096              # rows per block: 4096*128*4B = 2 MiB f32 / input
VMEM_LIMIT = 48 * 1024 * 1024


def _round_up(x, m):
    return ((x + m - 1) // m) * m


def _n_split():
    """Leading 'parallel' grid extent: 2 on multi-TensorCore chips, else 1."""
    try:
        kind = jax.devices()[0].device_kind.lower()
    except Exception:
        return 1
    if any(tag in kind for tag in ("v7", "7x", "v4", "v5p")):
        return 2
    return 1


def _dice_sums_kernel(p_ref, t_ref, out_ref, acc_i, acc_pt, *,
                      n, tm, inner, steps_total, has_tail, has_oob):
    c = pl.program_id(0)
    i = pl.program_id(1)
    g = c * inner + i                      # logical row-block index
    last_g = steps_total - 1

    @pl.when(i == 0)
    def _():
        acc_i[...] = jnp.zeros_like(acc_i)
        acc_pt[...] = jnp.zeros_like(acc_pt)

    def accumulate(mask_tail):
        x = p_ref[...].astype(jnp.float32)
        t = t_ref[...].astype(jnp.float32)
        # sigmoid(x) == 0.5 * tanh(0.5 * x) + 0.5 : one EUP transcendental
        # plus cheap VPU mul/add.
        p = 0.5 * jnp.tanh(0.5 * x) + 0.5
        if mask_tail:
            # Only the final logical block can contain padded / out-of-range
            # elements.  Row/lane split keeps comparisons in int32 range.
            row0 = last_g * tm             # static Python int
            r = row0 + jax.lax.broadcasted_iota(jnp.int32, (tm, LANES), 0)
            full_rows = n // LANES
            rem = n % LANES
            valid = r < full_rows
            if rem:
                l = jax.lax.broadcasted_iota(jnp.int32, (tm, LANES), 1)
                valid = jnp.logical_or(
                    valid, jnp.logical_and(r == full_rows, l < rem))
            p = jnp.where(valid, p, 0.0)
            t = jnp.where(valid, t, 0.0)
        # In-register tile reduction to (8,128) partials: pure VPU adds over
        # the sublane-tile axis (no XLU, no full-tile accumulator stores).
        inter = (p * t).reshape(tm // 8, 8, LANES)
        both = (p + t).reshape(tm // 8, 8, LANES)
        acc_i[...] += jnp.sum(inter, axis=0)
        acc_pt[...] += jnp.sum(both, axis=0)

    if has_tail:
        @pl.when(g < last_g)
        def _():
            accumulate(False)

        @pl.when(g == last_g)
        def _():
            accumulate(True)
    elif has_oob:
        @pl.when(g <= last_g)
        def _():
            accumulate(False)
    else:
        accumulate(False)

    # Epilogue: one tiny lane-dense store of the two (8,128) partial sums.
    @pl.when(i == pl.num_programs(1) - 1)
    def _():
        out_ref[0, 0, :, :] = acc_i[...]
        out_ref[0, 1, :, :] = acc_pt[...]


def dice_loss(predictions, targets, smooth=1e-6):
    """Pallas-TPU equivalent of PyTorch DiceLoss.forward (returns a scalar)."""
    n = predictions.size
    p_flat = jnp.ravel(predictions)        # native dtype; upcast in-kernel
    t_flat = jnp.ravel(targets)

    rows = pl.cdiv(n, LANES)
    padded_len = rows * LANES
    if padded_len != n:
        # Minimal lane-alignment pad; padded elements are masked in-kernel and
        # only the tail block pays the mask cost.
        p_flat = jnp.pad(p_flat, (0, padded_len - n))
        t_flat = jnp.pad(t_flat, (0, padded_len - n))
    p2d = p_flat.reshape(rows, LANES)
    t2d = t_flat.reshape(rows, LANES)

    tm = min(MAX_ROWS, _round_up(rows, 8))
    steps_total = pl.cdiv(rows, tm)
    n_split = min(_n_split(), steps_total)
    inner = pl.cdiv(steps_total, n_split)

    has_oob = (n_split * inner) != steps_total       # clamped, skipped blocks
    has_tail = (steps_total * tm * LANES) != n       # last block partially valid

    def in_index_map(c, i):
        g = c * inner + i
        if has_oob:
            g = jnp.minimum(g, steps_total - 1)      # keep the DMA in bounds
        return (g, 0)

    kernel = functools.partial(
        _dice_sums_kernel, n=n, tm=tm, inner=inner, steps_total=steps_total,
        has_tail=has_tail, has_oob=has_oob)

    parts = pl.pallas_call(
        kernel,
        out_shape=jax.ShapeDtypeStruct((n_split, 2, 8, LANES), jnp.float32),
        grid_spec=pltpu.PrefetchScalarGridSpec(
            num_scalar_prefetch=0,
            grid=(n_split, inner),
            in_specs=[
                pl.BlockSpec((tm, LANES), in_index_map),
                pl.BlockSpec((tm, LANES), in_index_map),
            ],
            out_specs=pl.BlockSpec((1, 2, 8, LANES), lambda c, i: (c, 0, 0, 0)),
            scratch_shapes=[
                pltpu.VMEM((8, LANES), jnp.float32),   # sum(p*t) partials
                pltpu.VMEM((8, LANES), jnp.float32),   # sum(p)+sum(t) partials
            ],
        ),
        compiler_params=pltpu.CompilerParams(
            dimension_semantics=("parallel", "arbitrary"),
            vmem_limit_bytes=VMEM_LIMIT,
        ),
    )(p2d, t2d)

    sums = jnp.sum(parts, axis=(0, 2, 3))            # [intersection, sum_p+sum_t]
    intersection, denom = sums[0], sums[1]
    dice_coeff = (2.0 * intersection + smooth) / (denom + smooth)
    return 1.0 - dice_coeff


def dice_loss_ref(predictions, targets, smooth=1e-6):
    p = jax.nn.sigmoid(predictions.astype(jnp.float32)).ravel()
    t = targets.astype(jnp.float32).ravel()
    intersection = jnp.sum(p * t)
    dice_coeff = (2.0 * intersection + smooth) / (jnp.sum(p) + jnp.sum(t) + smooth)
    return 1.0 - dice_coeff


if __name__ == "__main__":
    key = jax.random.PRNGKey(0)
    k1, k2, k3, k4 = jax.random.split(key, 4)

    # Small segmentation-style shapes: batch=2, channels=4, spatial=16x16 (NCHW).
    predictions = jax.random.normal(k1, (2, 4, 16, 16), dtype=jnp.float32)
    targets = (jax.random.uniform(k2, (2, 4, 16, 16)) > 0.5).astype(jnp.float32)

    loss = jax.block_until_ready(dice_loss(predictions, targets))
    ref = jax.block_until_ready(dice_loss_ref(predictions, targets))
    assert jnp.allclose(loss, ref, atol=1e-5, rtol=1e-5), (loss, ref)

    # Non-lane-aligned shape exercises the masked tail-block path.
    predictions2 = jax.random.normal(k3, (2, 3, 17, 19), dtype=jnp.float32)
    targets2 = (jax.random.uniform(k4, (2, 3, 17, 19)) > 0.5).astype(jnp.float32)

    loss2 = jax.block_until_ready(dice_loss(predictions2, targets2))
    ref2 = jax.block_until_ready(dice_loss_ref(predictions2, targets2))
    assert jnp.allclose(loss2, ref2, atol=1e-5, rtol=1e-5), (loss2, ref2)

    print("KERNEL_OK")
</pallas_src>

<mosaic_0001>
module attributes {stable_mosaic.version = 11 : i64} {
  func.func @_dice_sums_kernel(%arg0: i32, %arg1: i32, %arg2: memref<16x128xf32, #tpu.memory_space<vmem>>, %arg3: memref<16x128xf32, #tpu.memory_space<vmem>>, %arg4: memref<1x2x8x128xf32, #tpu.memory_space<vmem>>, %arg5: memref<8x128xf32, #tpu.memory_space<vmem>>, %arg6: memref<8x128xf32, #tpu.memory_space<vmem>>) attributes {dimension_semantics = [#tpu.dimension_semantics<parallel>, #tpu.dimension_semantics<arbitrary>], iteration_bounds = array<i64: 1, 1>, scalar_prefetch = 0 : i64, scratch_operands = 2 : i64, tpu.core_type = #tpu.core_type<tc>, window_params = [{transform_indices = @transform_0, window_bounds = array<i64: 16, 128>}, {transform_indices = @transform_1, window_bounds = array<i64: 16, 128>}, {transform_indices = @transform_2, window_bounds = array<i64: 1, 2, 8, 128>}]} {
    %c0_i32 = arith.constant 0 : i32
    %0 = arith.cmpi eq, %arg1, %c0_i32 : i32
    %1 = arith.extui %0 : i1 to i32
    %c0_i32_0 = arith.constant 0 : i32
    %2 = arith.cmpi ne, %1, %c0_i32_0 : i32
    scf.if %2 {
      %cst_18 = arith.constant 0.000000e+00 : f32
      %27 = vector.broadcast %cst_18 : f32 to vector<8x128xf32>
      %c0_19 = arith.constant 0 : index
      %c0_20 = arith.constant 0 : index
      %28 = vector.load %arg5[%c0_19, %c0_20] : memref<8x128xf32, #tpu.memory_space<vmem>>, vector<8x128xf32>
      tpu.vector_store %arg5[%c0_19, %c0_20], %27 {strides = array<i32>} : memref<8x128xf32, #tpu.memory_space<vmem>>, vector<8x128xf32>,
      %cst_21 = arith.constant 0.000000e+00 : f32
      %29 = vector.broadcast %cst_21 : f32 to vector<8x128xf32>
      %c0_22 = arith.constant 0 : index
      %c0_23 = arith.constant 0 : index
      %30 = vector.load %arg6[%c0_22, %c0_23] : memref<8x128xf32, #tpu.memory_space<vmem>>, vector<8x128xf32>
      tpu.vector_store %arg6[%c0_22, %c0_23], %29 {strides = array<i32>} : memref<8x128xf32, #tpu.memory_space<vmem>>, vector<8x128xf32>,
    } else {
    }
    %c0 = arith.constant 0 : index
    %c0_1 = arith.constant 0 : index
    %3 = vector.load %arg2[%c0, %c0_1] : memref<16x128xf32, #tpu.memory_space<vmem>>, vector<16x128xf32>
    %c0_2 = arith.constant 0 : index
    %c0_3 = arith.constant 0 : index
    %4 = vector.load %arg3[%c0_2, %c0_3] : memref<16x128xf32, #tpu.memory_space<vmem>>, vector<16x128xf32>
    %cst = arith.constant 5.000000e-01 : f32
    %5 = vector.broadcast %cst : f32 to vector<16x128xf32>
    %6 = arith.mulf %5, %3 : vector<16x128xf32>
    %7 = math.tanh %6 : vector<16x128xf32>
    %cst_4 = arith.constant 5.000000e-01 : f32
    %8 = vector.broadcast %cst_4 : f32 to vector<16x128xf32>
    %9 = arith.mulf %8, %7 : vector<16x128xf32>
    %cst_5 = arith.constant 5.000000e-01 : f32
    %10 = vector.broadcast %cst_5 : f32 to vector<16x128xf32>
    %11 = arith.addf %9, %10 : vector<16x128xf32>
    %12 = arith.mulf %11, %4 : vector<16x128xf32>
    %13 = vector.shape_cast %12 : vector<16x128xf32> to vector<2x8x128xf32>
    %14 = arith.addf %11, %4 : vector<16x128xf32>
    %15 = vector.shape_cast %14 : vector<16x128xf32> to vector<2x8x128xf32>
    %c0_6 = arith.constant 0 : index
    %c0_7 = arith.constant 0 : index
    %16 = vector.load %arg5[%c0_6, %c0_7] : memref<8x128xf32, #tpu.memory_space<vmem>>, vector<8x128xf32>
    %cst_8 = arith.constant dense<0.000000e+00> : vector<8x128xf32>
    %17 = vector.multi_reduction <add>, %13, %cst_8 [0] : vector<2x8x128xf32> to vector<8x128xf32>
    %18 = arith.addf %16, %17 : vector<8x128xf32>
    %c0_9 = arith.constant 0 : index
    %c0_10 = arith.constant 0 : index
    %19 = vector.load %arg5[%c0_9, %c0_10] : memref<8x128xf32, #tpu.memory_space<vmem>>, vector<8x128xf32>
    tpu.vector_store %arg5[%c0_9, %c0_10], %18 {strides = array<i32>} : memref<8x128xf32, #tpu.memory_space<vmem>>, vector<8x128xf32>,
    %c0_11 = arith.constant 0 : index
    %c0_12 = arith.constant 0 : index
    %20 = vector.load %arg6[%c0_11, %c0_12] : memref<8x128xf32, #tpu.memory_space<vmem>>, vector<8x128xf32>
    %cst_13 = arith.constant dense<0.000000e+00> : vector<8x128xf32>
    %21 = vector.multi_reduction <add>, %15, %cst_13 [0] : vector<2x8x128xf32> to vector<8x128xf32>
    %22 = arith.addf %20, %21 : vector<8x128xf32>
    %c0_14 = arith.constant 0 : index
    %c0_15 = arith.constant 0 : index
    %23 = vector.load %arg6[%c0_14, %c0_15] : memref<8x128xf32, #tpu.memory_space<vmem>>, vector<8x128xf32>
    tpu.vector_store %arg6[%c0_14, %c0_15], %22 {strides = array<i32>} : memref<8x128xf32, #tpu.memory_space<vmem>>, vector<8x128xf32>,
    %c0_i32_16 = arith.constant 0 : i32
    %24 = arith.cmpi eq, %arg1, %c0_i32_16 : i32
    %25 = arith.extui %24 : i1 to i32
    %c0_i32_17 = arith.constant 0 : i32
    %26 = arith.cmpi ne, %25, %c0_i32_17 : i32
    scf.if %26 {
      %c0_18 = arith.constant 0 : index
      %c0_19 = arith.constant 0 : index
      %27 = vector.load %arg5[%c0_18, %c0_19] : memref<8x128xf32, #tpu.memory_space<vmem>>, vector<8x128xf32>
      %c0_20 = arith.constant 0 : index
      %c0_21 = arith.constant 0 : index
      %c0_22 = arith.constant 0 : index
      %c0_23 = arith.constant 0 : index
      %28 = vector.load %arg4[%c0_20, %c0_21, %c0_22, %c0_23] : memref<1x2x8x128xf32, #tpu.memory_space<vmem>>, vector<1x1x8x128xf32>
      %29 = vector.shape_cast %28 : vector<1x1x8x128xf32> to vector<8x128xf32>
      %30 = vector.shape_cast %27 : vector<8x128xf32> to vector<1x1x8x128xf32>
      tpu.vector_store %arg4[%c0_20, %c0_21, %c0_22, %c0_23], %30 {strides = array<i32>} : memref<1x2x8x128xf32, #tpu.memory_space<vmem>>, vector<1x1x8x128xf32>,
      %c0_24 = arith.constant 0 : index
      %c0_25 = arith.constant 0 : index
      %31 = vector.load %arg6[%c0_24, %c0_25] : memref<8x128xf32, #tpu.memory_space<vmem>>, vector<8x128xf32>
      %c0_26 = arith.constant 0 : index
      %c1 = arith.constant 1 : index
      %c0_27 = arith.constant 0 : index
      %c0_28 = arith.constant 0 : index
      %32 = vector.load %arg4[%c0_26, %c1, %c0_27, %c0_28] : memref<1x2x8x128xf32, #tpu.memory_space<vmem>>, vector<1x1x8x128xf32>
      %33 = vector.shape_cast %32 : vector<1x1x8x128xf32> to vector<8x128xf32>
      %34 = vector.shape_cast %31 : vector<8x128xf32> to vector<1x1x8x128xf32>
      tpu.vector_store %arg4[%c0_26, %c1, %c0_27, %c0_28], %34 {strides = array<i32>} : memref<1x2x8x128xf32, #tpu.memory_space<vmem>>, vector<1x1x8x128xf32>,
    } else {
    }
    return
  }
  func.func @transform_0(%arg0: i32, %arg1: i32) -> (i32, i32) {
    %c1_i32 = arith.constant 1 : i32
    %0 = arith.muli %arg0, %c1_i32 : i32
    %1 = arith.addi %0, %arg1 : i32
    %c0_i32 = arith.constant 0 : i32
    %c0_i32_0 = arith.constant 0 : i32
    return %1, %c0_i32 : i32, i32
  }
  func.func @transform_1(%arg0: i32, %arg1: i32) -> (i32, i32) {
    %c1_i32 = arith.constant 1 : i32
    %0 = arith.muli %arg0, %c1_i32 : i32
    %1 = arith.addi %0, %arg1 : i32
    %c0_i32 = arith.constant 0 : i32
    %c0_i32_0 = arith.constant 0 : i32
    return %1, %c0_i32 : i32, i32
  }
  func.func @transform_2(%arg0: i32, %arg1: i32) -> (i32, i32, i32, i32) {
    %c0_i32 = arith.constant 0 : i32
    %c0_i32_0 = arith.constant 0 : i32
    %c0_i32_1 = arith.constant 0 : i32
    %c0_i32_2 = arith.constant 0 : i32
    return %arg0, %c0_i32, %c0_i32_0, %c0_i32_1 : i32, i32, i32, i32
  }
}

</mosaic_0001>

<bundles_post_ra>
// kernel: tpu_custom_call.1
= control target key start
LH: loop header
LB: loop body
LE: loop exit
PB: predicated region body
PF: predicated region fallthrough
CT: control target
= control target key end

     0   :  { %7 = vsyncpa [#allocation5], 0  ;;  %s239_s0 = inlined_call_operand.hbm [shape: f32[16,128], index: 0, kind: input, shape index: {}]   ;;  %s240_s1 = inlined_call_operand.hbm [shape: f32[16,128], index: 1, kind: input, shape index: {}]   ;;  %s241_s2 = inlined_call_operand.hbm [shape: f32[1,2,8,128], index: 2, kind: output, shape index: {}]  }
   0x1   :  { %8 = vsyncpa [#allocation8], 0 }
   0x2   :  { %9 = vsyncpa [#allocation6], 0  ;;  %s18_s11 = sshll.u32 %s239_s0, 4  ;;  %s201_s12 = smov [#allocation4]   ;;  %s19_s11 = int_to_ptr.hbm [resolvable:$true] %s18_s11 }
   0x3   :  { %s20_s13 = sshll.u32 %s201_s12, 4  ;;  %s35_s16 = sshll.u32 %s240_s1, 4  ;;  %s21_s13 = int_to_ptr.vmem [resolvable:$true] %s20_s13  ;;  %s36_s16 = int_to_ptr.hbm [resolvable:$true] %s35_s16 }
   0x4   :  { %s202_s17 = smov 128   ;;  %s203_s18 = smov 8  }
   0x5   :  { %26 = dma.hbm_to_vmem [thread:$0]  %s19_s11, 256, %s21_s13, [#allocation5], %s202_s17, %s202_s17, %s203_s18  }
   0x6   :  { %s204_s19 = smov [#allocation7]  }
   0x7   :  { %s37_s20 = sshll.u32 %s204_s19, 4  ;;  %s38_s20 = int_to_ptr.vmem [resolvable:$true] %s37_s20 }
   0x8   :  { %43 = dma.hbm_to_vmem [thread:$0]  %s36_s16, 256, %s38_s20, [#allocation8], %s202_s17, %s202_s17, %s203_s18  }
   0x9   :  { %195 = dma.done.wait [#allocation5], 256  }
   0xa   :  { %196 = vsyncadd [#allocation5], 4294967040 }
   0xb   :  { %197 = dma.done.wait [#allocation8], 256  }
   0xc   :  { %198 = vsyncadd [#allocation8], 4294967040  ;;  %v62_v0 = vld [vmem:[#allocation4] sm:$0xff]  ;;  %v63_v1 = vld [vmem:[#allocation4 + $0x8] sm:$0xff]  ;;  %s205_s0 = smov [#allocation9]   ;;  %s100_s23 = sshll.u32 %s241_s2, 4  ;;  %s101_s23 = int_to_ptr.hbm [resolvable:$true] %s100_s23 }
   0xd   :  { %v66_v2 = vmul.f32 0.5, %v62_v0  ;;  %v67_v3 = vmul.f32 0.5, %v63_v1  ;;  %v64_v7 = vld [vmem:[#allocation7] sm:$0xff]  ;;  %v65_v9 = vld [vmem:[#allocation7 + $0x8] sm:$0xff]  ;;  %s98_s1 = sshll.u32 %s205_s0, 4  ;;  %s99_s1 = int_to_ptr.vmem [resolvable:$true] %s98_s1 }
   0xf   :  { %119 = vtanh.f32 %v66_v2 }
  0x10   :  { %121 = vtanh.f32 %v67_v3 }
  0x15   :  { %v120_v4 = vpop.eup %119 }
  0x16   :  { %v122_v5 = vpop.eup %121  ;;  %v70_v6 = vmul.f32 0.5, %v120_v4 }
  0x17   :  { %v71_v8 = vmul.f32 0.5, %v122_v5 }
  0x18   :  { %v72_v10 = vadd.f32 0.5, %v70_v6 }
  0x19   :  { %v73_v11 = vadd.f32 0.5, %v71_v8 }
  0x1a   :  { %v74_v12 = vmul.f32 %v72_v10, %v64_v7  ;;  %v76_v13 = vadd.f32 %v72_v10, %v64_v7 }
  0x1b   :  { %v75_v14 = vmul.f32 %v73_v11, %v65_v9  ;;  %v77_v15 = vadd.f32 %v73_v11, %v65_v9 }
  0x1d   :  { %v79_v16 = vadd.f32 %v75_v14, %v74_v12  ;;  %v83_v17 = vadd.f32 %v77_v15, %v76_v13 }
  0x1f   :  { %90 = vst [vmem:[#allocation9] sm:$0xff] %v79_v16 }
  0x20   :  { %93 = vst [vmem:[#allocation9 + $0x8] sm:$0xff] %v83_v17 }
  0x21   :  { %106 = dma.vmem_to_hbm [thread:$0]  %s99_s1, 256, %s101_s23, [#allocation6], %s202_s17, %s202_s17, %s203_s18  }
  0x22   :  { %199 = dma.done.wait [#allocation6], 256  }
  0x23   :  { %200 = vsyncadd [#allocation6], 4294967040 }
  0x24   :  { %111 = vsyncpa [#allocation5], 1 }
  0x25   :  { %112 = vsyncpa [#allocation8], 1 }
  0x26   :  { %113 = vsyncpa [#allocation6], 1 }

</bundles_post_ra>
